<compile_context>
chip_gen: v5e
topology: v5e:2x2
jax: 0.10.0
libtpu: 0.0.40
codegen_flags: <defaults>
</compile_context>

<pallas_src>
import functools

import jax
import jax.numpy as jnp
from jax.experimental import pallas as pl
from jax.experimental.pallas import tpu as pltpu

LANE = 128
SUBLANE = 8


def _round_up(x: int, m: int) -> int:
    return (x + m - 1) // m * m


def _fused_mlp_kernel(*refs, num_layers: int, compute_dtype):
    """refs = (x_ref, w0, b0, w1, b1, ..., out_ref) for one row tile.

    out = L_{n-1}(relu(... relu(L_0(x)) ...)); activations stay on-chip.
    MXU operands are `compute_dtype` (bf16 by default), accumulation is f32.
    """
    x_ref = refs[0]
    out_ref = refs[-1]
    wb = refs[1:-1]

    h = x_ref[...].astype(compute_dtype)
    for i in range(num_layers):
        w = wb[2 * i][...]
        b = wb[2 * i + 1][...]
        acc = jnp.dot(h, w, preferred_element_type=jnp.float32)
        acc = acc + b.astype(jnp.float32)          # (TILE_N, H) + (1, H), VPU
        if i < num_layers - 1:
            # ReLU; Dropout(p=0) identity elided.
            h = jnp.maximum(acc, 0.0).astype(compute_dtype)
        else:
            out_ref[...] = acc.astype(out_ref.dtype)


def mlp_forward(params, x, *, compute_dtype=jnp.bfloat16, tile_n: int = 512):
    """Reproduces MLP.forward: flatten leading dims, fused MLP, reshape back.

    params: list of (w, b); w: (in_features, out_features) (transpose of
            PyTorch's Linear.weight), b: (out_features,) or (1, out_features).
    x:      (..., in_dim)
    compute_dtype: MXU operand dtype (bf16 default; f32 for exact checks).
    """
    lead_shape = x.shape[:-1]
    x2d = x.reshape(-1, x.shape[-1])
    n, in_dim = x2d.shape
    out_dtype = x.dtype
    num_layers = len(params)
    out_dim = params[-1][0].shape[1]

    # --- pad layer OUTPUT dims to lane multiples (zero pad => exact math) ---
    dims = [in_dim] + [w.shape[1] for w, _ in params]
    pdims = [in_dim] + [_round_up(max(d, 1), LANE) for d in dims[1:]]

    padded = []
    for i, (w, b) in enumerate(params):
        b2 = jnp.asarray(b).reshape(1, -1)
        rows, cols = pdims[i], pdims[i + 1]       # layer-0 rows = true in_dim
        w_p = jnp.zeros((rows, cols), compute_dtype)
        w_p = w_p.at[: w.shape[0], : w.shape[1]].set(w.astype(compute_dtype))
        b_p = jnp.zeros((1, cols), jnp.float32)
        b_p = b_p.at[:, : b2.shape[1]].set(b2.astype(jnp.float32))
        padded.append((w_p, b_p))

    # --- row tile selection ---
    tn = _round_up(min(int(tile_n), _round_up(n, SUBLANE)), SUBLANE)
    # Ensure >=2 grid steps when there is enough work, so v7x's 2 TensorCores
    # actually get rows to split under dimension_semantics=("parallel",).
    if n > SUBLANE and pl.cdiv(n, tn) < 2:
        tn = _round_up(pl.cdiv(n, 2), SUBLANE)

    # --- generation-aware VMEM budget ---
    x_is = jnp.dtype(x.dtype).itemsize
    c_is = jnp.dtype(compute_dtype).itemsize
    o_is = jnp.dtype(out_dtype).itemsize
    max_p = max(pdims)
    weights_bytes = sum(int(w.size) * c_is + int(b.size) * 4 for w, b in padded)

    def vmem_need(t):
        need = 2 * t * in_dim * x_is              # double-buffered input tile
        need += 2 * t * pdims[-1] * o_is          # double-buffered output tile
        need += weights_bytes                     # single-buffered resident W/b
        need += 3 * t * max_p * 4                 # f32 acc + intermediate h's
        return need

    try:
        vmem_cap = int(pltpu.get_tpu_info().vmem_capacity_bytes)
    except Exception:
        vmem_cap = 64 * 1024 * 1024
    vmem_cap = int(vmem_cap * 0.75)               # headroom for compiler scratch

    while tn > SUBLANE and vmem_need(tn) > vmem_cap:
        tn = _round_up(tn // 2, SUBLANE)
    # TODO(synk): if the resident weight set alone exceeds vmem_cap (huge hidden
    # dims on v7x), add a K-reduction grid axis ("arbitrary") instead of full
    # weight residency.
    grid = (pl.cdiv(n, tn),)
    vmem_limit = max(min(int(1.25 * vmem_need(tn)) + (2 << 20), vmem_cap), 1 << 20)

    flops = 2 * n * sum(pdims[i] * pdims[i + 1] for i in range(num_layers))
    bytes_accessed = n * in_dim * x_is + weights_bytes + n * pdims[-1] * o_is
    cost = pl.CostEstimate(flops=flops, transcendentals=0,
                           bytes_accessed=bytes_accessed)

    kernel = functools.partial(_fused_mlp_kernel, num_layers=num_layers,
                               compute_dtype=compute_dtype)

    def run(single_buffer_weights):
        wb_kwargs = {}
        if single_buffer_weights:
            wb_kwargs = dict(pipeline_mode=pl.Buffered(1))
        in_specs = [pl.BlockSpec((tn, in_dim), lambda i: (i, 0))]
        flat_wb = []
        for w_p, b_p in padded:
            in_specs.append(pl.BlockSpec(w_p.shape, lambda i: (0, 0), **wb_kwargs))
            in_specs.append(pl.BlockSpec(b_p.shape, lambda i: (0, 0), **wb_kwargs))
            flat_wb.extend([w_p, b_p])
        return pl.pallas_call(
            kernel,
            out_shape=jax.ShapeDtypeStruct((n, pdims[-1]), out_dtype),
            grid=grid,
            in_specs=in_specs,
            out_specs=pl.BlockSpec((tn, pdims[-1]), lambda i: (i, 0)),
            compiler_params=pltpu.CompilerParams(
                dimension_semantics=("parallel",),   # rows are independent
                vmem_limit_bytes=int(vmem_limit),
            ),
            cost_estimate=cost,
        )(x2d, *flat_wb)

    try:
        out = run(True)
    except Exception:
        # pl.Buffered(1) unsupported on this jax build: fall back to the
        # default double-buffered weight specs (correct, slightly more VMEM).
        out = run(False)

    return out[:, :out_dim].reshape(*lead_shape, out_dim)


def init_mlp_params(key, in_dim, out_dim, hidden_list, dtype=jnp.float32):
    """Deterministic synthetic parameters (PyTorch-Linear-like uniform init)."""
    dims = [in_dim] + list(hidden_list) + [out_dim]
    params = []
    for i in range(len(dims) - 1):
        fan_in, fan_out = dims[i], dims[i + 1]
        key, kw, kb = jax.random.split(key, 3)
        bound = 1.0 / (fan_in ** 0.5)
        w = jax.random.uniform(kw, (fan_in, fan_out), dtype, -bound, bound)
        b = jax.random.uniform(kb, (1, fan_out), dtype, -bound, bound)
        params.append((w, b))
    return params


def mlp_reference(params, x):
    """Pure-JAX f32 reference for correctness checks."""
    lead_shape = x.shape[:-1]
    h = x.reshape(-1, x.shape[-1])
    n_layers = len(params)
    for idx, (w, b) in enumerate(params):
        h = h @ w + b.reshape(1, -1)
        if idx < n_layers - 1:
            h = jnp.maximum(h, 0.0)
    return h.reshape(*lead_shape, -1)


if __name__ == "__main__":
    key = jax.random.PRNGKey(0)
    in_dim, out_dim, hidden_list = 16, 4, [32, 32]
    batch, seq = 2, 8  # leading dims; forward flattens them

    k_x, k_p = jax.random.split(key)
    x = jax.random.normal(k_x, (batch, seq, in_dim), dtype=jnp.float32)
    params = init_mlp_params(k_p, in_dim, out_dim, hidden_list)

    ref = mlp_reference(params, x)

    # Exact check with the f32 MXU path.
    out_f32 = jax.block_until_ready(mlp_forward(params, x, compute_dtype=jnp.float32))
    assert out_f32.shape == (batch, seq, out_dim), out_f32.shape
    assert jnp.allclose(out_f32, ref, atol=1e-5, rtol=1e-5), "f32 kernel mismatch"

    # Default fast path: bf16 operands, f32 accumulation.
    out_bf16 = jax.block_until_ready(mlp_forward(params, x))
    assert out_bf16.shape == (batch, seq, out_dim), out_bf16.shape
    assert jnp.allclose(out_bf16, ref, atol=3e-2, rtol=3e-2), "bf16 kernel mismatch"

    print("KERNEL_OK")
</pallas_src>

<mosaic_0001>
module attributes {stable_mosaic.version = 11 : i64} {
  func.func @_fused_mlp_kernel(%arg0: i32, %arg1: memref<8x16xf32, #tpu.memory_space<vmem>>, %arg2: memref<16x128xf32, #tpu.memory_space<vmem>>, %arg3: memref<1x128xf32, #tpu.memory_space<vmem>>, %arg4: memref<128x128xf32, #tpu.memory_space<vmem>>, %arg5: memref<1x128xf32, #tpu.memory_space<vmem>>, %arg6: memref<128x128xf32, #tpu.memory_space<vmem>>, %arg7: memref<1x128xf32, #tpu.memory_space<vmem>>, %arg8: memref<8x128xf32, #tpu.memory_space<vmem>>) attributes {dimension_semantics = [#tpu.dimension_semantics<parallel>], iteration_bounds = array<i64: 2>, scalar_prefetch = 0 : i64, scratch_operands = 0 : i64, tpu.core_type = #tpu.core_type<tc>, window_params = [{transform_indices = @transform_0, window_bounds = array<i64: 8, 16>}, {pipeline_mode = #tpu.pipeline_mode<synchronous>, transform_indices = @transform_1, window_bounds = array<i64: 16, 128>}, {pipeline_mode = #tpu.pipeline_mode<synchronous>, transform_indices = @transform_2, window_bounds = array<i64: 1, 128>}, {pipeline_mode = #tpu.pipeline_mode<synchronous>, transform_indices = @transform_3, window_bounds = array<i64: 128, 128>}, {pipeline_mode = #tpu.pipeline_mode<synchronous>, transform_indices = @transform_4, window_bounds = array<i64: 1, 128>}, {pipeline_mode = #tpu.pipeline_mode<synchronous>, transform_indices = @transform_5, window_bounds = array<i64: 128, 128>}, {pipeline_mode = #tpu.pipeline_mode<synchronous>, transform_indices = @transform_6, window_bounds = array<i64: 1, 128>}, {transform_indices = @transform_7, window_bounds = array<i64: 8, 128>}]} {
    %c0 = arith.constant 0 : index
    %c0_0 = arith.constant 0 : index
    %0 = vector.load %arg1[%c0, %c0_0] : memref<8x16xf32, #tpu.memory_space<vmem>>, vector<8x16xf32>
    %c0_1 = arith.constant 0 : index
    %c0_2 = arith.constant 0 : index
    %1 = vector.load %arg2[%c0_1, %c0_2] : memref<16x128xf32, #tpu.memory_space<vmem>>, vector<16x128xf32>
    %c0_3 = arith.constant 0 : index
    %c0_4 = arith.constant 0 : index
    %2 = vector.load %arg3[%c0_3, %c0_4] : memref<1x128xf32, #tpu.memory_space<vmem>>, vector<1x128xf32>
    %cst = arith.constant dense<0.000000e+00> : vector<8x128xf32>
    %3 = tpu.matmul %0, %1, %cst {dimension_numbers = #tpu.dot_dimension_numbers<[1], [0], [0], [1], [0, 0, 1, 1], [], []>} : vector<8x16xf32>, vector<16x128xf32>, vector<8x128xf32> -> vector<8x128xf32>
    %4 = vector.broadcast %2 : vector<1x128xf32> to vector<8x128xf32>
    %5 = arith.addf %3, %4 : vector<8x128xf32>
    %cst_5 = arith.constant 0.000000e+00 : f32
    %6 = vector.broadcast %cst_5 : f32 to vector<8x128xf32>
    %7 = arith.maximumf %5, %6 : vector<8x128xf32>
    %c0_6 = arith.constant 0 : index
    %c0_7 = arith.constant 0 : index
    %8 = vector.load %arg4[%c0_6, %c0_7] : memref<128x128xf32, #tpu.memory_space<vmem>>, vector<128x128xf32>
    %c0_8 = arith.constant 0 : index
    %c0_9 = arith.constant 0 : index
    %9 = vector.load %arg5[%c0_8, %c0_9] : memref<1x128xf32, #tpu.memory_space<vmem>>, vector<1x128xf32>
    %cst_10 = arith.constant dense<0.000000e+00> : vector<8x128xf32>
    %10 = tpu.matmul %7, %8, %cst_10 {dimension_numbers = #tpu.dot_dimension_numbers<[1], [0], [0], [1], [0, 0, 1, 1], [], []>} : vector<8x128xf32>, vector<128x128xf32>, vector<8x128xf32> -> vector<8x128xf32>
    %11 = vector.broadcast %9 : vector<1x128xf32> to vector<8x128xf32>
    %12 = arith.addf %10, %11 : vector<8x128xf32>
    %cst_11 = arith.constant 0.000000e+00 : f32
    %13 = vector.broadcast %cst_11 : f32 to vector<8x128xf32>
    %14 = arith.maximumf %12, %13 : vector<8x128xf32>
    %c0_12 = arith.constant 0 : index
    %c0_13 = arith.constant 0 : index
    %15 = vector.load %arg6[%c0_12, %c0_13] : memref<128x128xf32, #tpu.memory_space<vmem>>, vector<128x128xf32>
    %c0_14 = arith.constant 0 : index
    %c0_15 = arith.constant 0 : index
    %16 = vector.load %arg7[%c0_14, %c0_15] : memref<1x128xf32, #tpu.memory_space<vmem>>, vector<1x128xf32>
    %cst_16 = arith.constant dense<0.000000e+00> : vector<8x128xf32>
    %17 = tpu.matmul %14, %15, %cst_16 {dimension_numbers = #tpu.dot_dimension_numbers<[1], [0], [0], [1], [0, 0, 1, 1], [], []>} : vector<8x128xf32>, vector<128x128xf32>, vector<8x128xf32> -> vector<8x128xf32>
    %18 = vector.broadcast %16 : vector<1x128xf32> to vector<8x128xf32>
    %19 = arith.addf %17, %18 : vector<8x128xf32>
    %c0_17 = arith.constant 0 : index
    %c0_18 = arith.constant 0 : index
    %20 = vector.load %arg8[%c0_17, %c0_18] : memref<8x128xf32, #tpu.memory_space<vmem>>, vector<8x128xf32>
    tpu.vector_store %arg8[%c0_17, %c0_18], %19 {strides = array<i32>} : memref<8x128xf32, #tpu.memory_space<vmem>>, vector<8x128xf32>,
    return
  }
  func.func @transform_0(%arg0: i32) -> (i32, i32) {
    %c0_i32 = arith.constant 0 : i32
    %c0_i32_0 = arith.constant 0 : i32
    return %arg0, %c0_i32 : i32, i32
  }
  func.func @transform_1(%arg0: i32) -> (i32, i32) {
    %c0_i32 = arith.constant 0 : i32
    %c0_i32_0 = arith.constant 0 : i32
    %c0_i32_1 = arith.constant 0 : i32
    return %c0_i32, %c0_i32_0 : i32, i32
  }
  func.func @transform_2(%arg0: i32) -> (i32, i32) {
    %c0_i32 = arith.constant 0 : i32
    %c0_i32_0 = arith.constant 0 : i32
    %c0_i32_1 = arith.constant 0 : i32
    return %c0_i32, %c0_i32_0 : i32, i32
  }
  func.func @transform_3(%arg0: i32) -> (i32, i32) {
    %c0_i32 = arith.constant 0 : i32
    %c0_i32_0 = arith.constant 0 : i32
    %c0_i32_1 = arith.constant 0 : i32
    return %c0_i32, %c0_i32_0 : i32, i32
  }
  func.func @transform_4(%arg0: i32) -> (i32, i32) {
    %c0_i32 = arith.constant 0 : i32
    %c0_i32_0 = arith.constant 0 : i32
    %c0_i32_1 = arith.constant 0 : i32
    return %c0_i32, %c0_i32_0 : i32, i32
  }
  func.func @transform_5(%arg0: i32) -> (i32, i32) {
    %c0_i32 = arith.constant 0 : i32
    %c0_i32_0 = arith.constant 0 : i32
    %c0_i32_1 = arith.constant 0 : i32
    return %c0_i32, %c0_i32_0 : i32, i32
  }
  func.func @transform_6(%arg0: i32) -> (i32, i32) {
    %c0_i32 = arith.constant 0 : i32
    %c0_i32_0 = arith.constant 0 : i32
    %c0_i32_1 = arith.constant 0 : i32
    return %c0_i32, %c0_i32_0 : i32, i32
  }
  func.func @transform_7(%arg0: i32) -> (i32, i32) {
    %c0_i32 = arith.constant 0 : i32
    %c0_i32_0 = arith.constant 0 : i32
    return %arg0, %c0_i32 : i32, i32
  }
}

module attributes {stable_mosaic.version = 11 : i64} {
  func.func @_fused_mlp_kernel(%arg0: i32, %arg1: memref<8x16xf32, #tpu.memory_space<vmem>>, %arg2: memref<16x128xf32, #tpu.memory_space<vmem>>, %arg3: memref<1x128xf32, #tpu.memory_space<vmem>>, %arg4: memref<128x128xf32, #tpu.memory_space<vmem>>, %arg5: memref<1x128xf32, #tpu.memory_space<vmem>>, %arg6: memref<128x128xf32, #tpu.memory_space<vmem>>, %arg7: memref<1x128xf32, #tpu.memory_space<vmem>>, %arg8: memref<8x128xf32, #tpu.memory_space<vmem>>) attributes {dimension_semantics = [#tpu.dimension_semantics<parallel>], iteration_bounds = array<i64: 2>, scalar_prefetch = 0 : i64, scratch_operands = 0 : i64, tpu.core_type = #tpu.core_type<tc>, window_params = [{transform_indices = @transform_0, window_bounds = array<i64: 8, 16>}, {pipeline_mode = #tpu.pipeline_mode<synchronous>, transform_indices = @transform_1, window_bounds = array<i64: 16, 128>}, {pipeline_mode = #tpu.pipeline_mode<synchronous>, transform_indices = @transform_2, window_bounds = array<i64: 1, 128>}, {pipeline_mode = #tpu.pipeline_mode<synchronous>, transform_indices = @transform_3, window_bounds = array<i64: 128, 128>}, {pipeline_mode = #tpu.pipeline_mode<synchronous>, transform_indices = @transform_4, window_bounds = array<i64: 1, 128>}, {pipeline_mode = #tpu.pipeline_mode<synchronous>, transform_indices = @transform_5, window_bounds = array<i64: 128, 128>}, {pipeline_mode = #tpu.pipeline_mode<synchronous>, transform_indices = @transform_6, window_bounds = array<i64: 1, 128>}, {transform_indices = @transform_7, window_bounds = array<i64: 8, 128>}]} {
    %c0 = arith.constant 0 : index
    %c0_0 = arith.constant 0 : index
    %0 = vector.load %arg1[%c0, %c0_0] : memref<8x16xf32, #tpu.memory_space<vmem>>, vector<8x16xf32>
    %c0_1 = arith.constant 0 : index
    %c0_2 = arith.constant 0 : index
    %1 = vector.load %arg2[%c0_1, %c0_2] : memref<16x128xf32, #tpu.memory_space<vmem>>, vector<16x128xf32>
    %c0_3 = arith.constant 0 : index
    %c0_4 = arith.constant 0 : index
    %2 = vector.load %arg3[%c0_3, %c0_4] : memref<1x128xf32, #tpu.memory_space<vmem>>, vector<1x128xf32>
    %cst = arith.constant dense<0.000000e+00> : vector<8x128xf32>
    %3 = tpu.matmul %0, %1, %cst {dimension_numbers = #tpu.dot_dimension_numbers<[1], [0], [0], [1], [0, 0, 1, 1], [], []>} : vector<8x16xf32>, vector<16x128xf32>, vector<8x128xf32> -> vector<8x128xf32>
    %4 = vector.broadcast %2 : vector<1x128xf32> to vector<8x128xf32>
    %5 = arith.addf %3, %4 : vector<8x128xf32>
    %cst_5 = arith.constant 0.000000e+00 : f32
    %6 = vector.broadcast %cst_5 : f32 to vector<8x128xf32>
    %7 = arith.maximumf %5, %6 : vector<8x128xf32>
    %c0_6 = arith.constant 0 : index
    %c0_7 = arith.constant 0 : index
    %8 = vector.load %arg4[%c0_6, %c0_7] : memref<128x128xf32, #tpu.memory_space<vmem>>, vector<128x128xf32>
    %c0_8 = arith.constant 0 : index
    %c0_9 = arith.constant 0 : index
    %9 = vector.load %arg5[%c0_8, %c0_9] : memref<1x128xf32, #tpu.memory_space<vmem>>, vector<1x128xf32>
    %cst_10 = arith.constant dense<0.000000e+00> : vector<8x128xf32>
    %10 = tpu.matmul %7, %8, %cst_10 {dimension_numbers = #tpu.dot_dimension_numbers<[1], [0], [0], [1], [0, 0, 1, 1], [], []>} : vector<8x128xf32>, vector<128x128xf32>, vector<8x128xf32> -> vector<8x128xf32>
    %11 = vector.broadcast %9 : vector<1x128xf32> to vector<8x128xf32>
    %12 = arith.addf %10, %11 : vector<8x128xf32>
    %cst_11 = arith.constant 0.000000e+00 : f32
    %13 = vector.broadcast %cst_11 : f32 to vector<8x128xf32>
    %14 = arith.maximumf %12, %13 : vector<8x128xf32>
    %c0_12 = arith.constant 0 : index
    %c0_13 = arith.constant 0 : index
    %15 = vector.load %arg6[%c0_12, %c0_13] : memref<128x128xf32, #tpu.memory_space<vmem>>, vector<128x128xf32>
    %c0_14 = arith.constant 0 : index
    %c0_15 = arith.constant 0 : index
    %16 = vector.load %arg7[%c0_14, %c0_15] : memref<1x128xf32, #tpu.memory_space<vmem>>, vector<1x128xf32>
    %cst_16 = arith.constant dense<0.000000e+00> : vector<8x128xf32>
    %17 = tpu.matmul %14, %15, %cst_16 {dimension_numbers = #tpu.dot_dimension_numbers<[1], [0], [0], [1], [0, 0, 1, 1], [], []>} : vector<8x128xf32>, vector<128x128xf32>, vector<8x128xf32> -> vector<8x128xf32>
    %18 = vector.broadcast %16 : vector<1x128xf32> to vector<8x128xf32>
    %19 = arith.addf %17, %18 : vector<8x128xf32>
    %c0_17 = arith.constant 0 : index
    %c0_18 = arith.constant 0 : index
    %20 = vector.load %arg8[%c0_17, %c0_18] : memref<8x128xf32, #tpu.memory_space<vmem>>, vector<8x128xf32>
    tpu.vector_store %arg8[%c0_17, %c0_18], %19 {strides = array<i32>} : memref<8x128xf32, #tpu.memory_space<vmem>>, vector<8x128xf32>,
    return
  }
  func.func @transform_0(%arg0: i32) -> (i32, i32) {
    %c0_i32 = arith.constant 0 : i32
    %c0_i32_0 = arith.constant 0 : i32
    return %arg0, %c0_i32 : i32, i32
  }
  func.func @transform_1(%arg0: i32) -> (i32, i32) {
    %c0_i32 = arith.constant 0 : i32
    %c0_i32_0 = arith.constant 0 : i32
    %c0_i32_1 = arith.constant 0 : i32
    return %c0_i32, %c0_i32_0 : i32, i32
  }
  func.func @transform_2(%arg0: i32) -> (i32, i32) {
    %c0_i32 = arith.constant 0 : i32
    %c0_i32_0 = arith.constant 0 : i32
    %c0_i32_1 = arith.constant 0 : i32
    return %c0_i32, %c0_i32_0 : i32, i32
  }
  func.func @transform_3(%arg0: i32) -> (i32, i32) {
    %c0_i32 = arith.constant 0 : i32
    %c0_i32_0 = arith.constant 0 : i32
    %c0_i32_1 = arith.constant 0 : i32
    return %c0_i32, %c0_i32_0 : i32, i32
  }
  func.func @transform_4(%arg0: i32) -> (i32, i32) {
    %c0_i32 = arith.constant 0 : i32
    %c0_i32_0 = arith.constant 0 : i32
    %c0_i32_1 = arith.constant 0 : i32
    return %c0_i32, %c0_i32_0 : i32, i32
  }
  func.func @transform_5(%arg0: i32) -> (i32, i32) {
    %c0_i32 = arith.constant 0 : i32
    %c0_i32_0 = arith.constant 0 : i32
    %c0_i32_1 = arith.constant 0 : i32
    return %c0_i32, %c0_i32_0 : i32, i32
  }
  func.func @transform_6(%arg0: i32) -> (i32, i32) {
    %c0_i32 = arith.constant 0 : i32
    %c0_i32_0 = arith.constant 0 : i32
    %c0_i32_1 = arith.constant 0 : i32
    return %c0_i32, %c0_i32_0 : i32, i32
  }
  func.func @transform_7(%arg0: i32) -> (i32, i32) {
    %c0_i32 = arith.constant 0 : i32
    %c0_i32_0 = arith.constant 0 : i32
    return %arg0, %c0_i32 : i32, i32
  }
}

</mosaic_0001>

<bundles_post_ra>
// kernel: tpu_custom_call.1
= control target key start
LH: loop header
LB: loop body
LE: loop exit
PB: predicated region body
PF: predicated region fallthrough
CT: control target
= control target key end

     0   :  { %s1086_s0 = inlined_call_operand.hbm [shape: f32[16,16], index: 0, kind: input, shape index: {}]   ;;  %s1087_s1 = inlined_call_operand.hbm [shape: f32[16,128], index: 1, kind: input, shape index: {}]   ;;  %s1088_s2 = inlined_call_operand.vmem [shape: f32[1,128], index: 2, kind: input, shape index: {}]   ;;  %s1089_s3 = inlined_call_operand.hbm [shape: f32[128,128], index: 3, kind: input, shape index: {}]   ;;  %s1090_s4 = inlined_call_operand.vmem [shape: f32[1,128], index: 4, kind: input, shape index: {}]   ;;  %s1091_s5 = inlined_call_operand.hbm [shape: f32[128,128], index: 5, kind: input, shape index: {}]   ;;  %s1092_s6 = inlined_call_operand.vmem [shape: f32[1,128], index: 6, kind: input, shape index: {}]   ;;  %s1093_s7 = inlined_call_operand.hbm [shape: f32[16,128], index: 7, kind: output, shape index: {}]  }
   0x1   :  { %1094 = sst [smem:[#allocation15_spill]] %s1087_s1 }
   0x2   :  { %12 = vsyncpa [#allocation3], 0 }
   0x3   :  { %14 = vsyncpa [#allocation3 + $0x1], 0 }
   0x4   :  { %15 = vsyncpa [#allocation6], 0 }
   0x5   :  { %16 = vsyncpa [#allocation9], 0 }
   0x6   :  { %17 = vsyncpa [#allocation4], 0 }
   0x7   :  { %19 = vsyncpa [#allocation4 + $0x1], 0  ;;  %s917_s24 = smov 0   ;;  %s919_s25 = smov 0  }
   0x8   :  { %s921_s26 = smov 0   ;;  %s923_s27 = smov 0  }
   0x9 LB: > { %s1095_s1 = sld [smem:[#allocation15_spill]]  ;;  %s941_s8 = sadd.s32 4294967295, %s870_s27   ;;  %s870_s27 = sphi %s923_s27, %s1106_s27   ;;  %s866_s26 = sphi %s921_s26, %s1105_s26   ;;  %s862_s25 = sphi %s919_s25, %s1104_s25   ;;  %s858_s24 = sphi %s917_s24, %s1103_s24  }
   0xa   : > { %p576_p0 = scmp.ge.s32.totalorder %s870_s27, 1  ;;  %p46_p1 = scmp.eq.s32.totalorder %s941_s8, 0 }
   0xb   : > { %p208_p2 = scmp.lt.s32.totalorder %s870_s27, 3  ;;  %s872_s10 = smov [#allocation5]  }
   0xc   : > { %s221_s11 = sshll.u32 %s872_s10, 4  ;;  %s236_s14 = sshll.u32 %s1089_s3, 4  ;;  %s222_s11 = int_to_ptr.vmem [resolvable:$true] %s221_s11  ;;  %s237_s14 = int_to_ptr.hbm [resolvable:$true] %s236_s14 }
   0xd   : > { %p946_p3 = pnand %p576_p0, %p208_p2  ;;  %s253_s18 = sshll.u32 %s1091_s5, 4  ;;  %s254_s18 = int_to_ptr.hbm [resolvable:$true] %s253_s18 }
   0xe   : > { %s873_s19 = smov [#allocation7]   ;;  %s874_s21 = smov 128  }
   0xf   : > { %s219_s30 = sshll.u32 %s1095_s1, 4  ;;  %p610_p4 = pneg %p946_p3  ;;  %s220_s30 = int_to_ptr.hbm [resolvable:$true] %s219_s30 }
  0x10   : > { %s238_s20 = sshll.u32 %s873_s19, 4  ;;  %s875_s22 = smov 8   ;;  %s239_s20 = int_to_ptr.vmem [resolvable:$true] %s238_s20 }
  0x11   : > { %p958_p6 = pnand %p610_p4, %p46_p1  ;;  %s876_s23 = smov [#allocation8]  }
  0x12   : > { %s255_s28 = sshll.u32 %s876_s23, 4  ;;  %s575_s29 = sadd.s32 4294967294, %s870_s27   ;;  %s256_s28 = int_to_ptr.vmem [resolvable:$true] %s255_s28 }
  0x13   : > { %613 = dma.hbm_to_vmem [thread:$0]  (!%p958_p6), %s220_s30, 256, %s222_s11, [#allocation6], %s874_s21, %s874_s21, %s875_s22  }
  0x14   : > { %616 = dma.hbm_to_vmem [thread:$0]  (!%p958_p6), %s237_s14, 2048, %s239_s20, [#allocation6], %s874_s21, %s874_s21, %s875_s22  }
  0x15   : > { %619 = dma.hbm_to_vmem [thread:$0]  (!%p958_p6), %s254_s18, 2048, %s256_s28, [#allocation9], %s874_s21, %s874_s21, %s875_s22  }
  0x16   : > { %s973_s10 = sadd.s32 1, %s870_s27   ;;  %s32_s12 = sadd.s32 1, %s866_s26 }
  0x17   : > { %s29_s30 = ssub.s32 %s870_s27, %s973_s10  ;;  %p39_p7 = scmp.ne.s32.totalorder %s866_s26, %s862_s25 }
  0x18   : > { %p30_p8 = scmp.eq.s32.totalorder %s29_s30, 0  ;;  %p40_p9 = scmp.eq.s32.totalorder %s870_s27, 0 }
  0x19   : > { %p45_p10 = scmp.ne.s32.totalorder %s862_s25, %s858_s24  ;;  %p195_p11 = scmp.eq.s32.totalorder %s941_s8, 1 }
  0x1a   : > { %s985_s11 = scalar_select %p30_p8, %s866_s26, %s32_s12  }
  0x1b   : > { %p989_p12 = por %p46_p1, %p45_p10  ;;  %p993_p13 = por %p195_p11, %p39_p7 }
  0x1c   : > { %p201_p0 = scmp.eq.s32.totalorder %s575_s29, 1  ;;  %p41_p2 = por %p40_p9, %p39_p7 }
  0x1d   : > { %s272_s15 = sand.u32 1, %s866_s26   ;;  %p631_p6 = scmp.lt.s32.totalorder %s870_s27, 2 }
  0x1e   : > { %p998_p4 = por %p201_p0, %p45_p10  ;;  %s581_s17 = sshll.u32 %s272_s15, 3 }
  0x1f   : > { %s582_s18 = sshll.u32 %s870_s27, 3  ;;  %s276_s23 = scalar_lea.vmem [#allocation2], %s581_s17 }
  0x20   : > { %s280_s21 = scalar_lea.hbm %s1086_s0, %s582_s18  ;;  %s284_s28 = sshll.u32 %s276_s23, 4  ;;  %s285_s28 = int_to_ptr.vmem [resolvable:$true] %s284_s28 }
  0x21   : > { %s282_s22 = sshll.u32 %s280_s21, 4  ;;  %p1007_p8 = pnand %p631_p6, %p41_p2  ;;  %s283_s22 = int_to_ptr.hbm [resolvable:$true] %s282_s22 }
  0x22   : > { %s273_s12 = scalar_lea.sflag [#allocation3], %s272_s15  ;;  %s766_s30 = sshra.s32 %s283_s22, 4  ;;  %s767_s30 = int_to_ptr.hbm [resolvable:$true] %s766_s30 }
  0x23   : > { %s768_s1 = scalar_lea.hbm %s767_s30, 8  ;;  %p770_p9 = pneg %p1007_p8 }
  0x24   : > { %p769_p7 = scmp.ne.s32.totalorder %s767_s30, %s768_s1  ;;  %s773_s17 = scalar_lea.hbm %s1086_s0, 16 }
  0x25   : > { %p774_p0 = scmp.lt.s32.totalorder %s767_s30, %s1086_s0  ;;  %p775_p2 = scmp.lt.s32.totalorder %s773_s17, %s768_s1 }
  0x26   : > { %p771_p10 = pnand %p770_p9, %p769_p7 }
  0x27   : > { %p776_p6 = por %p775_p2, %p774_p0 }
  0x28   : > { %p772_p11 = pneg %p771_p10 }
  0x2a   : > { %p777_p5 = pnand %p776_p6, %p772_p11 }
  0x2c   : > { %780 = shalt.err (!%p777_p5)
}
  0x2d   : > { %623 = dma.hbm_to_vmem [thread:$0]  (!%p1007_p8), %s283_s22, 128, %s285_s28, %s273_s12  }
  0x2e   : > { %293 = sbr.rel (%p946_p3) target bundleno = 457 (0x1c9), region = 48  ;;  %s1024_s15 = sand.u32 (!%p946_p3), 1, %s862_s25  }
  0x2f   : > { %s584_s23 = sshll.u32 (!%p946_p3), %s1024_s15, 3  ;;  %s296_s18 = scalar_lea.sflag (!%p946_p3), [#allocation3], %s1024_s15 }
  0x30   : > { %s299_s1 = scalar_lea.vmem (!%p946_p3), [#allocation2], %s584_s23 }
  0x33   : > { %841 = dma.done.wait (%p989_p12), %s296_s18, 128  }
  0x34   : > { %843 = vsyncadd (%p989_p12), %s296_s18, 4294967168 }
  0x35   : > { %845 = dma.done.wait (%p46_p1), [#allocation6], 2304  }
  0x36   : > { %847 = vsyncadd (%p46_p1), [#allocation6], 4294964992 }
  0x37   : > { %849 = dma.done.wait (%p46_p1), [#allocation9], 2048  }
  0x38   : > { %851 = vsyncadd (%p46_p1), [#allocation9], 4294965248  ;;  %v348_v0 = vld [vmem:[#allocation5 + $0x8] sm:$0xff]  ;;  %v347_v1 = vld [vmem:[#allocation5] sm:$0xff]  ;;  %vm353_vm0 = vcmask 130048   ;;  %s591_s29 = sshll.u32 %s941_s8, 3 }
  0x39   : > { %371 = vmatpush.msra.mxu0 %v348_v0  ;;  %v346_v2 = vld [vmem:[%s299_s1] sm:$0xff]  ;;  %v393_v3 = vld [vmem:[#allocation7 + $0x78] sm:$0xff]  ;;  %v392_v4 = vld [vmem:[#allocation7 + $0x70] sm:$0xff]  ;;  %s471_s19 = scalar_lea.hbm %s1093_s7, %s591_s29  ;;  %s345_s21 = scalar_lea.vmem [#allocation10], %s584_s23 }
  0x3a   : > { %398 = vmatpush.msra.mxu1 %v393_v3  ;;  %v391_v5 = vld [vmem:[#allocation7 + $0x68] sm:$0xff]  ;;  %v390_v6 = vld [vmem:[#allocation7 + $0x60] sm:$0xff]  ;;  %v389_v7 = vld [vmem:[#allocation7 + $0x58] sm:$0xff]  ;;  %s473_s18 = sshll.u32 %s345_s21, 4  ;;  %s475_s1 = sshll.u32 %s471_s19, 4  ;;  %s474_s18 = int_to_ptr.vmem [resolvable:$true] %s473_s18  ;;  %s476_s1 = int_to_ptr.hbm [resolvable:$true] %s475_s1 }
  0x3b   : > { %372 = vmatpush.msra.mxu0 %v347_v1  ;;  %v388_v8 = vld [vmem:[#allocation7 + $0x50] sm:$0xff]  ;;  %v387_v9 = vld [vmem:[#allocation7 + $0x48] sm:$0xff]  ;;  %v386_v10 = vld [vmem:[#allocation7 + $0x40] sm:$0xff]  ;;  %s461_s9 = scalar_lea.sflag [#allocation4], %s1024_s15  ;;  %s810_s8 = sshra.s32 %s476_s1, 4  ;;  %s811_s8 = int_to_ptr.hbm [resolvable:$true] %s810_s8 }
  0x3c   : > { %589 = vmatmul.msk.f32.vlgmr.msra.gmra.mxu0 %vm353_vm0, %v346_v2  ;;  %399 = vmatpush.msra.mxu1 %v392_v4  ;;  %v385_v11 = vld [vmem:[#allocation7 + $0x38] sm:$0xff]  ;;  %v384_v12 = vld [vmem:[#allocation7 + $0x30] sm:$0xff]  ;;  %v383_v13 = vld [vmem:[#allocation7 + $0x28] sm:$0xff]  ;;  %s812_s13 = scalar_lea.hbm %s811_s8, 8  ;;  %s816_s29 = scalar_lea.hbm %s1093_s7, 16 }
  0x3d   : > { %v382_v14 = vld [vmem:[#allocation7 + $0x20] sm:$0xff]  ;;  %v381_v15 = vld [vmem:[#allocation7 + $0x18] sm:$0xff]  ;;  %v380_v16 = vld [vmem:[#allocation7 + $0x10] sm:$0xff]  ;;  %p813_p1 = scmp.ne.s32.totalorder %s811_s8, %s812_s13  ;;  %p817_p12 = scmp.lt.s32.totalorder %s811_s8, %s1093_s7 }
  0x3e   : > { %400 = vmatpush.msra.mxu1 %v391_v5  ;;  %v379_v17 = vld [vmem:[#allocation7 + $0x8] sm:$0xff]  ;;  %v378_v18 = vld [vmem:[#allocation7] sm:$0xff]  ;;  %v434_v19 = vld [vmem:[#allocation8 + $0x78] sm:$0xff]  ;;  %p818_p8 = scmp.lt.s32.totalorder %s816_s29, %s812_s13 }
  0x3f   : > { %v433_v20 = vld [vmem:[#allocation8 + $0x70] sm:$0xff]  ;;  %439 = vmatpush.msra.mxu2 %v434_v19  ;;  %v432_v21 = vld [vmem:[#allocation8 + $0x68] sm:$0xff]  ;;  %v431_v22 = vld [vmem:[#allocation8 + $0x60] sm:$0xff]  ;;  %p814_p3 = pnand %p813_p1, %p993_p13 }
  0x40   : > { %401 = vmatpush.msra.mxu1 %v390_v6  ;;  %v430_v23 = vld [vmem:[#allocation8 + $0x58] sm:$0xff]  ;;  %v429_v24 = vld [vmem:[#allocation8 + $0x50] sm:$0xff]  ;;  %v428_v25 = vld [vmem:[#allocation8 + $0x48] sm:$0xff]  ;;  %p819_p7 = por %p818_p8, %p817_p12 }
  0x41   : > { %440 = vmatpush.msra.mxu2 %v433_v20  ;;  %v427_v26 = vld [vmem:[#allocation8 + $0x40] sm:$0xff]  ;;  %v426_v27 = vld [vmem:[#allocation8 + $0x38] sm:$0xff]  ;;  %v425_v28 = vld [vmem:[#allocation8 + $0x30] sm:$0xff]  ;;  %p815_p5 = pneg %p814_p3 }
  0x42   : > { %402 = vmatpush.msra.mxu1 %v389_v7  ;;  %v424_v29 = vld [vmem:[#allocation8 + $0x28] sm:$0xff]  ;;  %v423_v30 = vld [vmem:[#allocation8 + $0x20] sm:$0xff]  ;;  %v422_v31 = vld [vmem:[#allocation8 + $0x18] sm:$0xff] }
  0x43   : > { %441 = vmatpush.msra.mxu2 %v432_v21  ;;  %v673_v32 = vld [vmem:[%s1088_s2] ss:$0 sm:$0xff]  ;;  %v421_v36 = vld [vmem:[#allocation8 + $0x10] sm:$0xff]  ;;  %v420_v37 = vld [vmem:[#allocation8 + $0x8] sm:$0xff]  ;;  %p820_p9 = pnand %p819_p7, %p815_p5 }
  0x44   : > { %403 = vmatpush.msra.mxu1 %v388_v8  ;;  %v419_v38 = vld [vmem:[#allocation8] sm:$0xff] }
  0x45   : > { %442 = vmatpush.msra.mxu2 %v431_v22  ;;  %v674_v39 = vld [vmem:[%s1090_s4] ss:$0 sm:$0xff] }
  0x46   : > { %404 = vmatpush.msra.mxu1 %v387_v9  ;;  %v675_v43 = vld [vmem:[%s1092_s6] ss:$0 sm:$0xff] }
  0x47   : > { %443 = vmatpush.msra.mxu2 %v430_v23 }
  0x48   : > { %405 = vmatpush.msra.mxu1 %v386_v10 }
  0x49   : > { %444 = vmatpush.msra.mxu2 %v429_v24 }
  0x4a   : > { %406 = vmatpush.msra.mxu1 %v385_v11 }
  0x4b   : > { %445 = vmatpush.msra.mxu2 %v428_v25 }
  0x4c   : > { %407 = vmatpush.msra.mxu1 %v384_v12 }
  0x4d   : > { %446 = vmatpush.msra.mxu2 %v427_v26 }
  0x4e   : > { %408 = vmatpush.msra.mxu1 %v383_v13 }
  0x4f   : > { %447 = vmatpush.msra.mxu2 %v426_v27 }
  0x50   : > { %409 = vmatpush.msra.mxu1 %v382_v14 }
  0x51   : > { %448 = vmatpush.msra.mxu2 %v425_v28 }
  0x52   : > { %410 = vmatpush.msra.mxu1 %v381_v15 }
  0x53   : > { %449 = vmatpush.msra.mxu2 %v424_v29 }
  0x54   : > { %411 = vmatpush.msra.mxu1 %v380_v16 }
  0x55   : > { %450 = vmatpush.msra.mxu2 %v423_v30 }
  0x56   : > { %412 = vmatpush.msra.mxu1 %v379_v17 }
  0x57   : > { %451 = vmatpush.msra.mxu2 %v422_v31 }
  0x58   : > { %413 = vmatpush.msra.mxu1 %v378_v18 }
  0x59   : > { %452 = vmatpush.msra.mxu2 %v421_v36 }
  0x5b   : > { %453 = vmatpush.msra.mxu2 %v420_v37 }
  0x5d   : > { %454 = vmatpush.msra.mxu2 %v419_v38 }
  0xb9   : > { %v374_v33 = vpop.f32.mrf.mxu0 }
  0xba   : > { %v375_v34 = vadd.f32 %v673_v32, %v374_v33 }
  0xbc   : > { %v377_v35 = vmax.f32 %v375_v34, 0.0 }
  0xbe   : > { %414 = vmatmul.f32.vlgmr.msra.gmra.mxu1 %v377_v35 }
 0x13b   : > { %v415_v40 = vpop.f32.mrf.mxu1 }
 0x13c   : > { %v416_v41 = vadd.f32 %v674_v39, %v415_v40 }
 0x13e   : > { %v418_v42 = vmax.f32 %v416_v41, 0.0 }
 0x140   : > { %455 = vmatmul.f32.vlgmr.msra.gmra.mxu2 %v418_v42 }
 0x1c3   : > { %v456_v44 = vpop.f32.mrf.mxu2 }
 0x1c4   : > { %v457_v45 = vadd.f32 %v675_v43, %v456_v44 }
 0x1c6   : > { %459 = vst [vmem:[%s345_s21] sm:$0xff] %v457_v45 }
 0x1c7   : > { %823 = shalt.err (!%p820_p9)
}
 0x1c8   : > { %608 = dma.vmem_to_hbm [thread:$0]  (%p993_p13), %s474_s18, 128, %s476_s1, %s461_s9  }
 0x1c9 PF: > { %s487_s15 = sand.u32 1, %s858_s24   ;;  %p1102_p10 = scmp.ge.s32.totalorder %s870_s27, 2 }
 0x1ca   : > { %s488_s30 = scalar_lea.sflag [#allocation4], %s487_s15 }
 0x1cb   : > { %p625_p11 = pnand %p1102_p10, %p998_p4 }
 0x1cd   : > { %p626_p0 = pneg %p625_p11 }
 0x1cf   : > { %853 = dma.done.wait (%p626_p0), %s488_s30, 128  }
 0x1d0   : > { %855 = vsyncadd (%p626_p0), %s488_s30, 4294967168  ;;  %p22_p2 = scmp.ge.s32.totalorder %s973_s10, 4   ;;  %s1103_s24 = smov %s862_s25 }
 0x1d1   : > { %s1104_s25 = smov %s866_s26  ;;  %s1105_s26 = smov %s985_s11 }
 0x1d2   : > { %s1106_s27 = smov %s973_s10  ;;  %24 = sbr.rel (!%p22_p2) target bundleno = 9 (0x9), region = 105 }
 0x1d7   :  { %494 = vsyncpa [#allocation3], 1 }
 0x1d8   :  { %496 = vsyncpa [#allocation3 + $0x1], 1 }
 0x1d9   :  { %497 = vsyncpa [#allocation6], 1 }
 0x1da   :  { %498 = vsyncpa [#allocation9], 1 }
 0x1db   :  { %499 = vsyncpa [#allocation4], 1 }
 0x1dc   :  { %501 = vsyncpa [#allocation4 + $0x1], 1 }

// kernel: tpu_custom_call.1
= control target key start
LH: loop header
LB: loop body
LE: loop exit
PB: predicated region body
PF: predicated region fallthrough
CT: control target
= control target key end

     0   :  { %s1086_s0 = inlined_call_operand.hbm [shape: f32[16,16], index: 0, kind: input, shape index: {}]   ;;  %s1087_s1 = inlined_call_operand.hbm [shape: f32[16,128], index: 1, kind: input, shape index: {}]   ;;  %s1088_s2 = inlined_call_operand.vmem [shape: f32[1,128], index: 2, kind: input, shape index: {}]   ;;  %s1089_s3 = inlined_call_operand.hbm [shape: f32[128,128], index: 3, kind: input, shape index: {}]   ;;  %s1090_s4 = inlined_call_operand.vmem [shape: f32[1,128], index: 4, kind: input, shape index: {}]   ;;  %s1091_s5 = inlined_call_operand.hbm [shape: f32[128,128], index: 5, kind: input, shape index: {}]   ;;  %s1092_s6 = inlined_call_operand.vmem [shape: f32[1,128], index: 6, kind: input, shape index: {}]   ;;  %s1093_s7 = inlined_call_operand.hbm [shape: f32[16,128], index: 7, kind: output, shape index: {}]  }
   0x1   :  { %1094 = sst [smem:[#allocation15_spill]] %s1087_s1 }
   0x2   :  { %12 = vsyncpa [#allocation3], 0 }
   0x3   :  { %14 = vsyncpa [#allocation3 + $0x1], 0 }
   0x4   :  { %15 = vsyncpa [#allocation6], 0 }
   0x5   :  { %16 = vsyncpa [#allocation9], 0 }
   0x6   :  { %17 = vsyncpa [#allocation4], 0 }
   0x7   :  { %19 = vsyncpa [#allocation4 + $0x1], 0  ;;  %s917_s24 = smov 0   ;;  %s919_s25 = smov 0  }
   0x8   :  { %s921_s26 = smov 0   ;;  %s923_s27 = smov 0  }
   0x9 LB: > { %s1095_s1 = sld [smem:[#allocation15_spill]]  ;;  %s941_s8 = sadd.s32 4294967295, %s870_s27   ;;  %s870_s27 = sphi %s923_s27, %s1106_s27   ;;  %s866_s26 = sphi %s921_s26, %s1105_s26   ;;  %s862_s25 = sphi %s919_s25, %s1104_s25   ;;  %s858_s24 = sphi %s917_s24, %s1103_s24  }
   0xa   : > { %p576_p0 = scmp.ge.s32.totalorder %s870_s27, 1  ;;  %p46_p1 = scmp.eq.s32.totalorder %s941_s8, 0 }
   0xb   : > { %p208_p2 = scmp.lt.s32.totalorder %s870_s27, 3  ;;  %s872_s10 = smov [#allocation5]  }
   0xc   : > { %s221_s11 = sshll.u32 %s872_s10, 4  ;;  %s236_s14 = sshll.u32 %s1089_s3, 4  ;;  %s222_s11 = int_to_ptr.vmem [resolvable:$true] %s221_s11  ;;  %s237_s14 = int_to_ptr.hbm [resolvable:$true] %s236_s14 }
   0xd   : > { %p946_p3 = pnand %p576_p0, %p208_p2  ;;  %s253_s18 = sshll.u32 %s1091_s5, 4  ;;  %s254_s18 = int_to_ptr.hbm [resolvable:$true] %s253_s18 }
   0xe   : > { %s873_s19 = smov [#allocation7]   ;;  %s874_s21 = smov 128  }
   0xf   : > { %s219_s30 = sshll.u32 %s1095_s1, 4  ;;  %p610_p4 = pneg %p946_p3  ;;  %s220_s30 = int_to_ptr.hbm [resolvable:$true] %s219_s30 }
  0x10   : > { %s238_s20 = sshll.u32 %s873_s19, 4  ;;  %s875_s22 = smov 8   ;;  %s239_s20 = int_to_ptr.vmem [resolvable:$true] %s238_s20 }
  0x11   : > { %p958_p6 = pnand %p610_p4, %p46_p1  ;;  %s876_s23 = smov [#allocation8]  }
  0x12   : > { %s255_s28 = sshll.u32 %s876_s23, 4  ;;  %s575_s29 = sadd.s32 4294967294, %s870_s27   ;;  %s256_s28 = int_to_ptr.vmem [resolvable:$true] %s255_s28 }
  0x13   : > { %613 = dma.hbm_to_vmem [thread:$0]  (!%p958_p6), %s220_s30, 256, %s222_s11, [#allocation6], %s874_s21, %s874_s21, %s875_s22  }
  0x14   : > { %616 = dma.hbm_to_vmem [thread:$0]  (!%p958_p6), %s237_s14, 2048, %s239_s20, [#allocation6], %s874_s21, %s874_s21, %s875_s22  }
  0x15   : > { %619 = dma.hbm_to_vmem [thread:$0]  (!%p958_p6), %s254_s18, 2048, %s256_s28, [#allocation9], %s874_s21, %s874_s21, %s875_s22  }
  0x16   : > { %s973_s10 = sadd.s32 1, %s870_s27   ;;  %s32_s12 = sadd.s32 1, %s866_s26 }
  0x17   : > { %s29_s30 = ssub.s32 %s870_s27, %s973_s10  ;;  %p39_p7 = scmp.ne.s32.totalorder %s866_s26, %s862_s25 }
  0x18   : > { %p30_p8 = scmp.eq.s32.totalorder %s29_s30, 0  ;;  %p40_p9 = scmp.eq.s32.totalorder %s870_s27, 0 }
  0x19   : > { %p45_p10 = scmp.ne.s32.totalorder %s862_s25, %s858_s24  ;;  %p195_p11 = scmp.eq.s32.totalorder %s941_s8, 1 }
  0x1a   : > { %s985_s11 = scalar_select %p30_p8, %s866_s26, %s32_s12  }
  0x1b   : > { %p989_p12 = por %p46_p1, %p45_p10  ;;  %p993_p13 = por %p195_p11, %p39_p7 }
  0x1c   : > { %p201_p0 = scmp.eq.s32.totalorder %s575_s29, 1  ;;  %p41_p2 = por %p40_p9, %p39_p7 }
  0x1d   : > { %s272_s15 = sand.u32 1, %s866_s26   ;;  %p631_p6 = scmp.lt.s32.totalorder %s870_s27, 2 }
  0x1e   : > { %p998_p4 = por %p201_p0, %p45_p10  ;;  %s581_s17 = sshll.u32 %s272_s15, 3 }
  0x1f   : > { %s582_s18 = sshll.u32 %s870_s27, 3  ;;  %s276_s23 = scalar_lea.vmem [#allocation2], %s581_s17 }
  0x20   : > { %s280_s21 = scalar_lea.hbm %s1086_s0, %s582_s18  ;;  %s284_s28 = sshll.u32 %s276_s23, 4  ;;  %s285_s28 = int_to_ptr.vmem [resolvable:$true] %s284_s28 }
  0x21   : > { %s282_s22 = sshll.u32 %s280_s21, 4  ;;  %p1007_p8 = pnand %p631_p6, %p41_p2  ;;  %s283_s22 = int_to_ptr.hbm [resolvable:$true] %s282_s22 }
  0x22   : > { %s273_s12 = scalar_lea.sflag [#allocation3], %s272_s15  ;;  %s766_s30 = sshra.s32 %s283_s22, 4  ;;  %s767_s30 = int_to_ptr.hbm [resolvable:$true] %s766_s30 }
  0x23   : > { %s768_s1 = scalar_lea.hbm %s767_s30, 8  ;;  %p770_p9 = pneg %p1007_p8 }
  0x24   : > { %p769_p7 = scmp.ne.s32.totalorder %s767_s30, %s768_s1  ;;  %s773_s17 = scalar_lea.hbm %s1086_s0, 16 }
  0x25   : > { %p774_p0 = scmp.lt.s32.totalorder %s767_s30, %s1086_s0  ;;  %p775_p2 = scmp.lt.s32.totalorder %s773_s17, %s768_s1 }
  0x26   : > { %p771_p10 = pnand %p770_p9, %p769_p7 }
  0x27   : > { %p776_p6 = por %p775_p2, %p774_p0 }
  0x28   : > { %p772_p11 = pneg %p771_p10 }
  0x2a   : > { %p777_p5 = pnand %p776_p6, %p772_p11 }
  0x2c   : > { %780 = shalt.err (!%p777_p5)
}
  0x2d   : > { %623 = dma.hbm_to_vmem [thread:$0]  (!%p1007_p8), %s283_s22, 128, %s285_s28, %s273_s12  }
  0x2e   : > { %293 = sbr.rel (%p946_p3) target bundleno = 457 (0x1c9), region = 48  ;;  %s1024_s15 = sand.u32 (!%p946_p3), 1, %s862_s25  }
  0x2f   : > { %s584_s23 = sshll.u32 (!%p946_p3), %s1024_s15, 3  ;;  %s296_s18 = scalar_lea.sflag (!%p946_p3), [#allocation3], %s1024_s15 }
  0x30   : > { %s299_s1 = scalar_lea.vmem (!%p946_p3), [#allocation2], %s584_s23 }
  0x33   : > { %841 = dma.done.wait (%p989_p12), %s296_s18, 128  }
  0x34   : > { %843 = vsyncadd (%p989_p12), %s296_s18, 4294967168 }
  0x35   : > { %845 = dma.done.wait (%p46_p1), [#allocation6], 2304  }
  0x36   : > { %847 = vsyncadd (%p46_p1), [#allocation6], 4294964992 }
  0x37   : > { %849 = dma.done.wait (%p46_p1), [#allocation9], 2048  }
  0x38   : > { %851 = vsyncadd (%p46_p1), [#allocation9], 4294965248  ;;  %v348_v0 = vld [vmem:[#allocation5 + $0x8] sm:$0xff]  ;;  %v347_v1 = vld [vmem:[#allocation5] sm:$0xff]  ;;  %vm353_vm0 = vcmask 130048   ;;  %s591_s29 = sshll.u32 %s941_s8, 3 }
  0x39   : > { %371 = vmatpush.msra.mxu0 %v348_v0  ;;  %v346_v2 = vld [vmem:[%s299_s1] sm:$0xff]  ;;  %v393_v3 = vld [vmem:[#allocation7 + $0x78] sm:$0xff]  ;;  %v392_v4 = vld [vmem:[#allocation7 + $0x70] sm:$0xff]  ;;  %s471_s19 = scalar_lea.hbm %s1093_s7, %s591_s29  ;;  %s345_s21 = scalar_lea.vmem [#allocation10], %s584_s23 }
  0x3a   : > { %398 = vmatpush.msra.mxu1 %v393_v3  ;;  %v391_v5 = vld [vmem:[#allocation7 + $0x68] sm:$0xff]  ;;  %v390_v6 = vld [vmem:[#allocation7 + $0x60] sm:$0xff]  ;;  %v389_v7 = vld [vmem:[#allocation7 + $0x58] sm:$0xff]  ;;  %s473_s18 = sshll.u32 %s345_s21, 4  ;;  %s475_s1 = sshll.u32 %s471_s19, 4  ;;  %s474_s18 = int_to_ptr.vmem [resolvable:$true] %s473_s18  ;;  %s476_s1 = int_to_ptr.hbm [resolvable:$true] %s475_s1 }
  0x3b   : > { %372 = vmatpush.msra.mxu0 %v347_v1  ;;  %v388_v8 = vld [vmem:[#allocation7 + $0x50] sm:$0xff]  ;;  %v387_v9 = vld [vmem:[#allocation7 + $0x48] sm:$0xff]  ;;  %v386_v10 = vld [vmem:[#allocation7 + $0x40] sm:$0xff]  ;;  %s461_s9 = scalar_lea.sflag [#allocation4], %s1024_s15  ;;  %s810_s8 = sshra.s32 %s476_s1, 4  ;;  %s811_s8 = int_to_ptr.hbm [resolvable:$true] %s810_s8 }
  0x3c   : > { %589 = vmatmul.msk.f32.vlgmr.msra.gmra.mxu0 %vm353_vm0, %v346_v2  ;;  %399 = vmatpush.msra.mxu1 %v392_v4  ;;  %v385_v11 = vld [vmem:[#allocation7 + $0x38] sm:$0xff]  ;;  %v384_v12 = vld [vmem:[#allocation7 + $0x30] sm:$0xff]  ;;  %v383_v13 = vld [vmem:[#allocation7 + $0x28] sm:$0xff]  ;;  %s812_s13 = scalar_lea.hbm %s811_s8, 8  ;;  %s816_s29 = scalar_lea.hbm %s1093_s7, 16 }
  0x3d   : > { %v382_v14 = vld [vmem:[#allocation7 + $0x20] sm:$0xff]  ;;  %v381_v15 = vld [vmem:[#allocation7 + $0x18] sm:$0xff]  ;;  %v380_v16 = vld [vmem:[#allocation7 + $0x10] sm:$0xff]  ;;  %p813_p1 = scmp.ne.s32.totalorder %s811_s8, %s812_s13  ;;  %p817_p12 = scmp.lt.s32.totalorder %s811_s8, %s1093_s7 }
  0x3e   : > { %400 = vmatpush.msra.mxu1 %v391_v5  ;;  %v379_v17 = vld [vmem:[#allocation7 + $0x8] sm:$0xff]  ;;  %v378_v18 = vld [vmem:[#allocation7] sm:$0xff]  ;;  %v434_v19 = vld [vmem:[#allocation8 + $0x78] sm:$0xff]  ;;  %p818_p8 = scmp.lt.s32.totalorder %s816_s29, %s812_s13 }
  0x3f   : > { %v433_v20 = vld [vmem:[#allocation8 + $0x70] sm:$0xff]  ;;  %439 = vmatpush.msra.mxu2 %v434_v19  ;;  %v432_v21 = vld [vmem:[#allocation8 + $0x68] sm:$0xff]  ;;  %v431_v22 = vld [vmem:[#allocation8 + $0x60] sm:$0xff]  ;;  %p814_p3 = pnand %p813_p1, %p993_p13 }
  0x40   : > { %401 = vmatpush.msra.mxu1 %v390_v6  ;;  %v430_v23 = vld [vmem:[#allocation8 + $0x58] sm:$0xff]  ;;  %v429_v24 = vld [vmem:[#allocation8 + $0x50] sm:$0xff]  ;;  %v428_v25 = vld [vmem:[#allocation8 + $0x48] sm:$0xff]  ;;  %p819_p7 = por %p818_p8, %p817_p12 }
  0x41   : > { %440 = vmatpush.msra.mxu2 %v433_v20  ;;  %v427_v26 = vld [vmem:[#allocation8 + $0x40] sm:$0xff]  ;;  %v426_v27 = vld [vmem:[#allocation8 + $0x38] sm:$0xff]  ;;  %v425_v28 = vld [vmem:[#allocation8 + $0x30] sm:$0xff]  ;;  %p815_p5 = pneg %p814_p3 }
  0x42   : > { %402 = vmatpush.msra.mxu1 %v389_v7  ;;  %v424_v29 = vld [vmem:[#allocation8 + $0x28] sm:$0xff]  ;;  %v423_v30 = vld [vmem:[#allocation8 + $0x20] sm:$0xff]  ;;  %v422_v31 = vld [vmem:[#allocation8 + $0x18] sm:$0xff] }
  0x43   : > { %441 = vmatpush.msra.mxu2 %v432_v21  ;;  %v673_v32 = vld [vmem:[%s1088_s2] ss:$0 sm:$0xff]  ;;  %v421_v36 = vld [vmem:[#allocation8 + $0x10] sm:$0xff]  ;;  %v420_v37 = vld [vmem:[#allocation8 + $0x8] sm:$0xff]  ;;  %p820_p9 = pnand %p819_p7, %p815_p5 }
  0x44   : > { %403 = vmatpush.msra.mxu1 %v388_v8  ;;  %v419_v38 = vld [vmem:[#allocation8] sm:$0xff] }
  0x45   : > { %442 = vmatpush.msra.mxu2 %v431_v22  ;;  %v674_v39 = vld [vmem:[%s1090_s4] ss:$0 sm:$0xff] }
  0x46   : > { %404 = vmatpush.msra.mxu1 %v387_v9  ;;  %v675_v43 = vld [vmem:[%s1092_s6] ss:$0 sm:$0xff] }
  0x47   : > { %443 = vmatpush.msra.mxu2 %v430_v23 }
  0x48   : > { %405 = vmatpush.msra.mxu1 %v386_v10 }
  0x49   : > { %444 = vmatpush.msra.mxu2 %v429_v24 }
  0x4a   : > { %406 = vmatpush.msra.mxu1 %v385_v11 }
  0x4b   : > { %445 = vmatpush.msra.mxu2 %v428_v25 }
  0x4c   : > { %407 = vmatpush.msra.mxu1 %v384_v12 }
  0x4d   : > { %446 = vmatpush.msra.mxu2 %v427_v26 }
  0x4e   : > { %408 = vmatpush.msra.mxu1 %v383_v13 }
  0x4f   : > { %447 = vmatpush.msra.mxu2 %v426_v27 }
  0x50   : > { %409 = vmatpush.msra.mxu1 %v382_v14 }
  0x51   : > { %448 = vmatpush.msra.mxu2 %v425_v28 }
  0x52   : > { %410 = vmatpush.msra.mxu1 %v381_v15 }
  0x53   : > { %449 = vmatpush.msra.mxu2 %v424_v29 }
  0x54   : > { %411 = vmatpush.msra.mxu1 %v380_v16 }
  0x55   : > { %450 = vmatpush.msra.mxu2 %v423_v30 }
  0x56   : > { %412 = vmatpush.msra.mxu1 %v379_v17 }
  0x57   : > { %451 = vmatpush.msra.mxu2 %v422_v31 }
  0x58   : > { %413 = vmatpush.msra.mxu1 %v378_v18 }
  0x59   : > { %452 = vmatpush.msra.mxu2 %v421_v36 }
  0x5b   : > { %453 = vmatpush.msra.mxu2 %v420_v37 }
  0x5d   : > { %454 = vmatpush.msra.mxu2 %v419_v38 }
  0xb9   : > { %v374_v33 = vpop.f32.mrf.mxu0 }
  0xba   : > { %v375_v34 = vadd.f32 %v673_v32, %v374_v33 }
  0xbc   : > { %v377_v35 = vmax.f32 %v375_v34, 0.0 }
  0xbe   : > { %414 = vmatmul.f32.vlgmr.msra.gmra.mxu1 %v377_v35 }
 0x13b   : > { %v415_v40 = vpop.f32.mrf.mxu1 }
 0x13c   : > { %v416_v41 = vadd.f32 %v674_v39, %v415_v40 }
 0x13e   : > { %v418_v42 = vmax.f32 %v416_v41, 0.0 }
 0x140   : > { %455 = vmatmul.f32.vlgmr.msra.gmra.mxu2 %v418_v42 }
 0x1c3   : > { %v456_v44 = vpop.f32.mrf.mxu2 }
 0x1c4   : > { %v457_v45 = vadd.f32 %v675_v43, %v456_v44 }
 0x1c6   : > { %459 = vst [vmem:[%s345_s21] sm:$0xff] %v457_v45 }
 0x1c7   : > { %823 = shalt.err (!%p820_p9)
}
 0x1c8   : > { %608 = dma.vmem_to_hbm [thread:$0]  (%p993_p13), %s474_s18, 128, %s476_s1, %s461_s9  }
 0x1c9 PF: > { %s487_s15 = sand.u32 1, %s858_s24   ;;  %p1102_p10 = scmp.ge.s32.totalorder %s870_s27, 2 }
 0x1ca   : > { %s488_s30 = scalar_lea.sflag [#allocation4], %s487_s15 }
 0x1cb   : > { %p625_p11 = pnand %p1102_p10, %p998_p4 }
 0x1cd   : > { %p626_p0 = pneg %p625_p11 }
 0x1cf   : > { %853 = dma.done.wait (%p626_p0), %s488_s30, 128  }
 0x1d0   : > { %855 = vsyncadd (%p626_p0), %s488_s30, 4294967168  ;;  %p22_p2 = scmp.ge.s32.totalorder %s973_s10, 4   ;;  %s1103_s24 = smov %s862_s25 }
 0x1d1   : > { %s1104_s25 = smov %s866_s26  ;;  %s1105_s26 = smov %s985_s11 }
 0x1d2   : > { %s1106_s27 = smov %s973_s10  ;;  %24 = sbr.rel (!%p22_p2) target bundleno = 9 (0x9), region = 105 }
 0x1d7   :  { %494 = vsyncpa [#allocation3], 1 }
 0x1d8   :  { %496 = vsyncpa [#allocation3 + $0x1], 1 }
 0x1d9   :  { %497 = vsyncpa [#allocation6], 1 }
 0x1da   :  { %498 = vsyncpa [#allocation9], 1 }
 0x1db   :  { %499 = vsyncpa [#allocation4], 1 }
 0x1dc   :  { %501 = vsyncpa [#allocation4 + $0x1], 1 }

</bundles_post_ra>
